<compile_context>
chip_gen: v6e
topology: v6e:2x2x1
jax: 0.10.0
libtpu: 0.0.40
codegen_flags: <defaults>
</compile_context>

<pallas_src>
import numpy as np
import jax
import jax.numpy as jnp
from jax.experimental import pallas as pl
from jax.experimental.pallas import tpu as pltpu

LANE = 128            # lane width of the dense output slab
SUBLANE = 8           # sublane granularity (f32)
MAX_BLOCK_ROWS = 8192 # 8192 rows * 128 lanes * 4 B = 4 MiB per output block


# ----------------------------- Pallas kernel --------------------------------
def _fill_kernel(s_ref, out_ref):
    # s_ref   : (1,) f32 SMEM -> precomputed sigmoid(fc_w*prob1 + fc_b)
    # out_ref : (block_rows, 128) f32 VMEM block of the dense output slab
    out_ref[...] = jnp.full(out_ref.shape, s_ref[0], dtype=out_ref.dtype)


# --------------------------------- wrapper -----------------------------------
def hybrid_vqc_forward(x, params, fc_w, fc_b, *, num_qubits, layers,
                       min_pallas_batch=1024):
    batch = x.shape[0]                      # forward() only uses x.shape[0]

    # ---- quantum part (batch independent), closed form ----------------------
    if num_qubits == 1:
        # RY(p0) ... RY(pL-1) on a single qubit (no CX) == RY(sum(params)),
        # so P(measure '1') = sin^2(sum / 2).  Exact counts['1'] / shots.
        prob1 = jnp.sin(jnp.sum(params.astype(jnp.float32)) / 2.0) ** 2
    else:
        # bitstring keys have length num_qubits > 1 => counts.get('1', 0) == 0
        # (reproduces the PyTorch reference quirk); no circuit sim needed.
        prob1 = jnp.float32(0.0)

    # fc(1 -> 1) + sigmoid, computed once as a scalar (kernel only broadcasts).
    s = jax.nn.sigmoid(fc_w.reshape(()).astype(jnp.float32) * prob1
                       + fc_b.reshape(()).astype(jnp.float32))

    # ---- tiny batch: Pallas launch overhead dominates -> plain broadcast ----
    if batch < min_pallas_batch:
        return jnp.full((batch, 1), s, dtype=jnp.float32)

    # ---- Pallas path: lane- and sublane-dense (rows_pad, 128) output slab ---
    rows = pl.cdiv(batch, LANE)
    rows_pad = max(SUBLANE, ((rows + SUBLANE - 1) // SUBLANE) * SUBLANE)
    block_rows = min(rows_pad, MAX_BLOCK_ROWS)
    num_blocks = pl.cdiv(rows_pad, block_rows)
    rows_pad = num_blocks * block_rows      # clean grid division

    s_arr = s.reshape((1,)).astype(jnp.float32)   # (1,) f32 -> SMEM

    out_slab = pl.pallas_call(
        _fill_kernel,
        out_shape=jax.ShapeDtypeStruct((rows_pad, LANE), jnp.float32),
        grid=(num_blocks,),
        in_specs=[pl.BlockSpec(memory_space=pltpu.MemorySpace.SMEM)],
        out_specs=pl.BlockSpec((block_rows, LANE), lambda i: (i, 0)),
        compiler_params=pltpu.CompilerParams(
            dimension_semantics=("parallel",)),   # v7x: shard blocks over 2 TCs
    )(s_arr)

    return out_slab.reshape(-1)[:batch].reshape(batch, 1)


# ----------------------------------- main ------------------------------------
if __name__ == "__main__":
    num_qubits, layers = 1, 4

    key = jax.random.PRNGKey(0)
    k_params, k_w, k_b, k_x = jax.random.split(key, 4)

    # nn.Parameter(torch.rand(num_qubits * layers)) -> U(0, 1)
    params = jax.random.uniform(k_params, (num_qubits * layers,), dtype=jnp.float32)
    # nn.Linear(1, 1) weight / bias (deterministic synthetic init)
    fc_w = jax.random.uniform(k_w, (1, 1), minval=-1.0, maxval=1.0, dtype=jnp.float32)
    fc_b = jax.random.uniform(k_b, (1,), minval=-1.0, maxval=1.0, dtype=jnp.float32)

    # Plain-JAX reference scalar: sigmoid(w * sin^2(sum(params)/2) + b)
    prob_ref = jnp.sin(jnp.sum(params) / 2.0) ** 2
    ref_scalar = jax.nn.sigmoid(fc_w[0, 0] * prob_ref + fc_b[0])

    # 1) Small batch (batch=2): fast path (no Pallas launch -- pure fixed cost).
    batch_small = 2
    x_small = jax.random.normal(k_x, (batch_small, 4), dtype=jnp.float32)
    out_small = hybrid_vqc_forward(x_small, params, fc_w, fc_b,
                                   num_qubits=num_qubits, layers=layers)
    out_small = jax.block_until_ready(out_small)
    ref_small = jnp.full((batch_small, 1), ref_scalar, dtype=jnp.float32)
    np.testing.assert_allclose(np.asarray(out_small), np.asarray(ref_small),
                               rtol=1e-5, atol=1e-6)

    # 2) Larger batch (batch=4096): exercises the Pallas kernel (single dense
    #    (32, 128) block, one grid step).
    batch_pallas = 4096
    x_pallas = jax.random.normal(k_x, (batch_pallas, 4), dtype=jnp.float32)
    out_pallas = hybrid_vqc_forward(x_pallas, params, fc_w, fc_b,
                                    num_qubits=num_qubits, layers=layers)
    out_pallas = jax.block_until_ready(out_pallas)
    ref_pallas = jnp.full((batch_pallas, 1), ref_scalar, dtype=jnp.float32)
    np.testing.assert_allclose(np.asarray(out_pallas), np.asarray(ref_pallas),
                               rtol=1e-5, atol=1e-6)

    print("KERNEL_OK")
</pallas_src>

<mosaic_0001>
module attributes {stable_mosaic.version = 11 : i64} {
  func.func @_fill_kernel(%arg0: i32, %arg1: memref<1xf32, #tpu.memory_space<smem>>, %arg2: memref<32x128xf32, #tpu.memory_space<vmem>>) attributes {dimension_semantics = [#tpu.dimension_semantics<parallel>], iteration_bounds = array<i64: 1>, scalar_prefetch = 0 : i64, scratch_operands = 0 : i64, tpu.core_type = #tpu.core_type<tc>, window_params = [{transform_indices = @transform_0, window_bounds = array<i64: 1>}, {transform_indices = @transform_1, window_bounds = array<i64: 32, 128>}]} {
    %c0 = arith.constant 0 : index
    %0 = memref.load %arg1[%c0] : memref<1xf32, #tpu.memory_space<smem>>
    %1 = vector.broadcast %0 : f32 to vector<32x128xf32>
    %c0_0 = arith.constant 0 : index
    %c0_1 = arith.constant 0 : index
    %2 = vector.load %arg2[%c0_0, %c0_1] : memref<32x128xf32, #tpu.memory_space<vmem>>, vector<32x128xf32>
    tpu.vector_store %arg2[%c0_0, %c0_1], %1 {strides = array<i32>} : memref<32x128xf32, #tpu.memory_space<vmem>>, vector<32x128xf32>,
    return
  }
  func.func @transform_0(%arg0: i32) -> i32 {
    %c0_i32 = arith.constant 0 : i32
    %c0_i32_0 = arith.constant 0 : i32
    return %c0_i32 : i32
  }
  func.func @transform_1(%arg0: i32) -> (i32, i32) {
    %c0_i32 = arith.constant 0 : i32
    %c0_i32_0 = arith.constant 0 : i32
    return %arg0, %c0_i32 : i32, i32
  }
}

</mosaic_0001>

<bundles_post_ra>
// kernel: tpu_custom_call.1
= control target key start
LH: loop header
LB: loop body
LE: loop exit
PB: predicated region body
PF: predicated region fallthrough
CT: control target
= control target key end

     0   :  { %s76_s0 = inlined_call_operand.<no memory space> [shape: f32[1], index: 0, kind: input, shape index: {}]   ;;  %s77_s1 = inlined_call_operand.hbm [shape: f32[32,128], index: 1, kind: output, shape index: {}]  }
   0x1   :  { %v11_v0 = vstv %s76_s0 }
   0x2   :  { %7 = vsyncpa [#allocation4], 0  ;;  %12 = vst [vmem:[#allocation3] sm:$0xff] %v11_v0  ;;  %s57_s8 = smov [#allocation3]  }
   0x3   :  { %13 = vst [vmem:[#allocation3 + $0x8] sm:$0xff] %v11_v0  ;;  %14 = vst [vmem:[#allocation3 + $0x10] sm:$0xff] %v11_v0  ;;  %s21_s9 = sshll.u32 %s57_s8, 4  ;;  %s22_s9 = int_to_ptr.vmem [resolvable:$true] %s21_s9 }
   0x4   :  { %15 = vst [vmem:[#allocation3 + $0x18] sm:$0xff] %v11_v0  ;;  %s35_s10 = scalar_lea.vmem %s22_s9, 512  ;;  %p40_p1 = scmp.lt.s32.totalorder %s22_s9, %s22_s9 }
   0x5   :  { %p36_p0 = scmp.ne.s32.totalorder %s22_s9, %s35_s10  ;;  %p41_p2 = scmp.lt.s32.totalorder %s35_s10, %s35_s10 }
   0x7   :  { %p42_p3 = por %p41_p2, %p40_p1 }
   0x9   :  { %p43_p4 = pnand %p42_p3, %p36_p0 }
   0xb   :  { %46 = shalt.err (!%p43_p4)
}
   0xc   :  { %s58_s11 = smov 128   ;;  %s59_s12 = smov 8  }
   0xd   :  { %27 = dma.vmem_to_hbm [thread:$0]  %s22_s9, 512, %s77_s1, [#allocation4], %s58_s11, %s58_s11, %s59_s12  }
   0xe   :  { %55 = dma.done.wait [#allocation4], 512  }
   0xf   :  { %56 = vsyncadd [#allocation4], 4294966784 }
  0x10   :  { %31 = vsyncpa [#allocation4], 1 }

</bundles_post_ra>
